<compile_context>
chip_gen: v5e
topology: v5e:2x2
jax: 0.10.0
libtpu: 0.0.40
codegen_flags: <defaults>
</compile_context>

<pallas_src>
import functools

import jax
import jax.numpy as jnp
from jax import lax
from jax.experimental import pallas as pl
from jax.experimental.pallas import tpu as pltpu


def _dv_js_kernel(x1_ref, x2_ref, x3_ref, out_ref, *, inv_t, batch, tile_rows):
    i = pl.program_id(0)

    # log-softmax of inputs3 (the log argument of KLDiv), computed once, f32.
    s3 = x3_ref[...].astype(jnp.float32) * inv_t
    s3 = s3 - jnp.max(s3, axis=-1, keepdims=True)
    k = s3 - jnp.log(jnp.sum(jnp.exp(s3), axis=-1, keepdims=True))     # (tm, C)

    def kl_to_k(x_ref):
        # Row-wise KL(softmax(s) || exp(k)) without materializing p / log_p:
        #   s' = s - max(s); e = exp(s'); Z = sum(e)
        #   sum_c p*(log p - k) = sum_c e*(s' - k) / Z - log(Z)
        s = x_ref[...].astype(jnp.float32) * inv_t
        s = s - jnp.max(s, axis=-1, keepdims=True)
        e = jnp.exp(s)
        z = jnp.sum(e, axis=-1, keepdims=True)                          # (tm, 1)
        num = jnp.sum(e * (s - k), axis=-1, keepdims=True)              # (tm, 1)
        return num * pl.reciprocal(z, approx=False) - jnp.log(z)        # (tm, 1)

    per_row = 0.5 * (kl_to_k(x1_ref) + kl_to_k(x2_ref))                 # (tm, 1)

    # Mask rows of a ragged last tile (OOB rows contain garbage / NaN);
    # mask is applied after the axis=-1 reductions, before the tile sum.
    row_idx = i * tile_rows + lax.broadcasted_iota(jnp.int32, per_row.shape, 0)
    per_row = jnp.where(row_idx < batch, per_row, 0.0)

    partial = jnp.sum(per_row)                  # scalar partial for this tile
    # Lane-dense (1,8,128) f32 store of the per-tile partial; the tiny final
    # reduction + /B (batchmean) happens in XLA.
    out_ref[...] = jnp.broadcast_to(partial, out_ref.shape)


def _sublane_multiple(dtype):
    itemsize = jnp.dtype(dtype).itemsize
    return {4: 8, 2: 16, 1: 32}.get(itemsize, 8)


def _batch_axis_semantics():
    """CORE_PARALLEL on multi-TensorCore chips (v7x), plain PARALLEL otherwise."""
    try:
        kind = jax.devices()[0].device_kind.lower()
    except Exception:
        kind = ""
    if "v7" in kind or "7x" in kind:
        return (pltpu.CORE_PARALLEL,)
    return (pltpu.PARALLEL,)


def dv_loss_js(inputs1, inputs2, inputs3, temper=2.0, block_rows=1024):
    """JS-divergence DVLoss between three logit tensors of shape [B, C].

    Inputs may be f32 or bf16 (bf16 halves HBM traffic; compute is f32 inside).
    """
    assert inputs1.shape == inputs2.shape == inputs3.shape
    assert inputs1.ndim == 2
    B, C = inputs1.shape
    itemsize = jnp.dtype(inputs1.dtype).itemsize
    sub = _sublane_multiple(inputs1.dtype)

    # VMEM sizing per tiled row:
    #   3 inputs x 2 pipeline buffers x C x itemsize      (BlockSpec DMA buffers)
    # + ~4 live f32 (tm, C) intermediates (k, s, e, e*(s-k)) -> 4 * C * 4 bytes
    # 10 MiB budget fits v5e's 16 MiB default scoped-VMEM limit and leaves
    # plenty of headroom on v6e (32 MiB default) and v7x (64 MiB physical).
    per_row_bytes = 6 * C * itemsize + 4 * C * 4
    vmem_budget = 10 * 1024 * 1024
    tm_max = max(sub, vmem_budget // per_row_bytes)
    tm = min(block_rows, tm_max)
    if tm >= B:
        tm = B                         # single tile: block == full array (always legal)
    else:
        tm = max(sub, (tm // sub) * sub)   # dtype-native sublane-aligned tile

    num_tiles = pl.cdiv(B, tm)

    kernel = functools.partial(
        _dv_js_kernel, inv_t=float(1.0 / temper), batch=B, tile_rows=tm)

    in_spec = pl.BlockSpec((tm, C), lambda i: (i, 0))
    out_spec = pl.BlockSpec((1, 8, 128), lambda i: (i, 0, 0))

    cost = pl.CostEstimate(
        flops=24 * B * C,                       # ~8 elementwise ops x 3 inputs
        transcendentals=3 * B * C + 4 * B,      # exps + per-row logs/recips
        bytes_accessed=3 * B * C * itemsize + num_tiles * 8 * 128 * 4,
    )

    partials = pl.pallas_call(
        kernel,
        grid=(num_tiles,),
        in_specs=[in_spec, in_spec, in_spec],
        out_specs=out_spec,
        out_shape=jax.ShapeDtypeStruct((num_tiles, 8, 128), jnp.float32),
        compiler_params=pltpu.CompilerParams(
            dimension_semantics=_batch_axis_semantics()),
        cost_estimate=cost,
    )(inputs1, inputs2, inputs3)

    # Tiny final reduction + batchmean normalization in XLA.
    return jnp.sum(partials[:, 0, 0]) / B


def _reference_js(x1, x2, x3, temper=2.0):
    p = jax.nn.softmax(x1 / temper, axis=1)
    q = jax.nn.softmax(x2 / temper, axis=1)
    k = jax.nn.log_softmax(x3 / temper, axis=1)
    b = x1.shape[0]
    kl1 = jnp.sum(p * (jax.nn.log_softmax(x1 / temper, axis=1) - k)) / b
    kl2 = jnp.sum(q * (jax.nn.log_softmax(x2 / temper, axis=1) - k)) / b
    return 0.5 * kl1 + 0.5 * kl2


if __name__ == "__main__":
    key = jax.random.PRNGKey(0)
    k1, k2, k3 = jax.random.split(key, 3)

    # Small logits consistent with the module: batch=8, classes=32.
    B, C = 8, 32
    x1 = jax.random.normal(k1, (B, C), dtype=jnp.float32)
    x2 = jax.random.normal(k2, (B, C), dtype=jnp.float32)
    x3 = jax.random.normal(k3, (B, C), dtype=jnp.float32)

    loss = jax.block_until_ready(dv_loss_js(x1, x2, x3, temper=2.0))
    ref = _reference_js(x1, x2, x3, temper=2.0)
    assert jnp.allclose(loss, ref, rtol=1e-4, atol=1e-5), (loss, ref)

    # Exercise the multi-tile + ragged-last-tile path (3 tiles of 16 rows,
    # last tile has only 8 valid rows).
    B2, C2 = 40, 160
    y1 = jax.random.normal(k1, (B2, C2), dtype=jnp.float32)
    y2 = jax.random.normal(k2, (B2, C2), dtype=jnp.float32)
    y3 = jax.random.normal(k3, (B2, C2), dtype=jnp.float32)
    loss2 = jax.block_until_ready(dv_loss_js(y1, y2, y3, temper=2.0, block_rows=16))
    ref2 = _reference_js(y1, y2, y3, temper=2.0)
    assert jnp.allclose(loss2, ref2, rtol=1e-3, atol=1e-4), (loss2, ref2)

    # bf16 logits at the HBM boundary (kernel upcasts to f32 internally).
    y1b, y2b, y3b = (v.astype(jnp.bfloat16) for v in (y1, y2, y3))
    loss3 = jax.block_until_ready(dv_loss_js(y1b, y2b, y3b, temper=2.0))
    ref3 = _reference_js(y1b.astype(jnp.float32), y2b.astype(jnp.float32),
                         y3b.astype(jnp.float32), temper=2.0)
    assert jnp.allclose(loss3, ref3, rtol=1e-3, atol=1e-4), (loss3, ref3)

    print("KERNEL_OK")
</pallas_src>

<mosaic_0001>
module attributes {stable_mosaic.version = 11 : i64} {
  func.func @_dv_js_kernel(%arg0: i32, %arg1: memref<8x32xf32, #tpu.memory_space<vmem>>, %arg2: memref<8x32xf32, #tpu.memory_space<vmem>>, %arg3: memref<8x32xf32, #tpu.memory_space<vmem>>, %arg4: memref<1x8x128xf32, #tpu.memory_space<vmem>>) attributes {dimension_semantics = [#tpu.dimension_semantics<parallel>], iteration_bounds = array<i64: 1>, scalar_prefetch = 0 : i64, scratch_operands = 0 : i64, tpu.core_type = #tpu.core_type<tc>, window_params = [{transform_indices = @transform_0, window_bounds = array<i64: 8, 32>}, {transform_indices = @transform_1, window_bounds = array<i64: 8, 32>}, {transform_indices = @transform_2, window_bounds = array<i64: 8, 32>}, {transform_indices = @transform_3, window_bounds = array<i64: 1, 8, 128>}]} {
    %c0 = arith.constant 0 : index
    %c0_0 = arith.constant 0 : index
    %0 = vector.load %arg3[%c0, %c0_0] : memref<8x32xf32, #tpu.memory_space<vmem>>, vector<8x32xf32>
    %cst = arith.constant 5.000000e-01 : f32
    %1 = vector.broadcast %cst : f32 to vector<8x32xf32>
    %2 = arith.mulf %0, %1 : vector<8x32xf32>
    %cst_1 = arith.constant dense<0xFF800000> : vector<8xf32>
    %3 = vector.multi_reduction <maximumf>, %2, %cst_1 [1] : vector<8x32xf32> to vector<8xf32>
    %4 = vector.shape_cast %3 : vector<8xf32> to vector<8x1xf32>
    %5 = vector.broadcast %4 : vector<8x1xf32> to vector<8x32xf32>
    %6 = arith.subf %2, %5 : vector<8x32xf32>
    %7 = math.exp %6 : vector<8x32xf32>
    %cst_2 = arith.constant dense<0.000000e+00> : vector<8xf32>
    %8 = vector.multi_reduction <add>, %7, %cst_2 [1] : vector<8x32xf32> to vector<8xf32>
    %9 = vector.shape_cast %8 : vector<8xf32> to vector<8x1xf32>
    %10 = math.log %9 : vector<8x1xf32>
    %11 = vector.broadcast %10 : vector<8x1xf32> to vector<8x32xf32>
    %12 = arith.subf %6, %11 : vector<8x32xf32>
    %c0_3 = arith.constant 0 : index
    %c0_4 = arith.constant 0 : index
    %13 = vector.load %arg1[%c0_3, %c0_4] : memref<8x32xf32, #tpu.memory_space<vmem>>, vector<8x32xf32>
    %cst_5 = arith.constant 5.000000e-01 : f32
    %14 = vector.broadcast %cst_5 : f32 to vector<8x32xf32>
    %15 = arith.mulf %13, %14 : vector<8x32xf32>
    %cst_6 = arith.constant dense<0xFF800000> : vector<8xf32>
    %16 = vector.multi_reduction <maximumf>, %15, %cst_6 [1] : vector<8x32xf32> to vector<8xf32>
    %17 = vector.shape_cast %16 : vector<8xf32> to vector<8x1xf32>
    %18 = vector.broadcast %17 : vector<8x1xf32> to vector<8x32xf32>
    %19 = arith.subf %15, %18 : vector<8x32xf32>
    %20 = math.exp %19 : vector<8x32xf32>
    %cst_7 = arith.constant dense<0.000000e+00> : vector<8xf32>
    %21 = vector.multi_reduction <add>, %20, %cst_7 [1] : vector<8x32xf32> to vector<8xf32>
    %22 = vector.shape_cast %21 : vector<8xf32> to vector<8x1xf32>
    %23 = arith.subf %19, %12 : vector<8x32xf32>
    %24 = arith.mulf %20, %23 : vector<8x32xf32>
    %cst_8 = arith.constant dense<0.000000e+00> : vector<8xf32>
    %25 = vector.multi_reduction <add>, %24, %cst_8 [1] : vector<8x32xf32> to vector<8xf32>
    %26 = vector.shape_cast %25 : vector<8xf32> to vector<8x1xf32>
    %27 = tpu.reciprocal %22 : vector<8x1xf32> -> vector<8x1xf32>
    %28 = arith.mulf %26, %27 : vector<8x1xf32>
    %29 = math.log %22 : vector<8x1xf32>
    %30 = arith.subf %28, %29 : vector<8x1xf32>
    %c0_9 = arith.constant 0 : index
    %c0_10 = arith.constant 0 : index
    %31 = vector.load %arg2[%c0_9, %c0_10] : memref<8x32xf32, #tpu.memory_space<vmem>>, vector<8x32xf32>
    %cst_11 = arith.constant 5.000000e-01 : f32
    %32 = vector.broadcast %cst_11 : f32 to vector<8x32xf32>
    %33 = arith.mulf %31, %32 : vector<8x32xf32>
    %cst_12 = arith.constant dense<0xFF800000> : vector<8xf32>
    %34 = vector.multi_reduction <maximumf>, %33, %cst_12 [1] : vector<8x32xf32> to vector<8xf32>
    %35 = vector.shape_cast %34 : vector<8xf32> to vector<8x1xf32>
    %36 = vector.broadcast %35 : vector<8x1xf32> to vector<8x32xf32>
    %37 = arith.subf %33, %36 : vector<8x32xf32>
    %38 = math.exp %37 : vector<8x32xf32>
    %cst_13 = arith.constant dense<0.000000e+00> : vector<8xf32>
    %39 = vector.multi_reduction <add>, %38, %cst_13 [1] : vector<8x32xf32> to vector<8xf32>
    %40 = vector.shape_cast %39 : vector<8xf32> to vector<8x1xf32>
    %41 = arith.subf %37, %12 : vector<8x32xf32>
    %42 = arith.mulf %38, %41 : vector<8x32xf32>
    %cst_14 = arith.constant dense<0.000000e+00> : vector<8xf32>
    %43 = vector.multi_reduction <add>, %42, %cst_14 [1] : vector<8x32xf32> to vector<8xf32>
    %44 = vector.shape_cast %43 : vector<8xf32> to vector<8x1xf32>
    %45 = tpu.reciprocal %40 : vector<8x1xf32> -> vector<8x1xf32>
    %46 = arith.mulf %44, %45 : vector<8x1xf32>
    %47 = math.log %40 : vector<8x1xf32>
    %48 = arith.subf %46, %47 : vector<8x1xf32>
    %49 = arith.addf %30, %48 : vector<8x1xf32>
    %cst_15 = arith.constant 5.000000e-01 : f32
    %50 = vector.broadcast %cst_15 : f32 to vector<8x1xf32>
    %51 = arith.mulf %50, %49 : vector<8x1xf32>
    %c8_i32 = arith.constant 8 : i32
    %52 = arith.muli %arg0, %c8_i32 : i32
    %53 = tpu.iota {dimensions = array<i32: 0>} : vector<8x1xi32>
    %54 = vector.broadcast %52 : i32 to vector<8x1xi32>
    %55 = arith.addi %54, %53 : vector<8x1xi32>
    %c8_i32_16 = arith.constant 8 : i32
    %56 = vector.broadcast %c8_i32_16 : i32 to vector<8x1xi32>
    %57 = arith.cmpi slt, %55, %56 : vector<8x1xi32>
    %cst_17 = arith.constant 0.000000e+00 : f32
    %58 = vector.broadcast %cst_17 : f32 to vector<8x1xf32>
    %59 = arith.select %57, %51, %58 : vector<8x1xi1>, vector<8x1xf32>
    %60 = vector.shape_cast %59 : vector<8x1xf32> to vector<1x8x1xf32>
    %cst_18 = arith.constant dense<0.000000e+00> : vector<1xf32>
    %61 = vector.multi_reduction <add>, %60, %cst_18 [1, 2] : vector<1x8x1xf32> to vector<1xf32>
    %62 = vector.shape_cast %61 : vector<1xf32> to vector<1x1x1xf32>
    %63 = vector.extract %62[0, 0, 0] : f32 from vector<1x1x1xf32>
    %64 = vector.broadcast %63 : f32 to vector<1x8x128xf32>
    %c0_19 = arith.constant 0 : index
    %c0_20 = arith.constant 0 : index
    %c0_21 = arith.constant 0 : index
    %65 = vector.load %arg4[%c0_19, %c0_20, %c0_21] : memref<1x8x128xf32, #tpu.memory_space<vmem>>, vector<1x8x128xf32>
    tpu.vector_store %arg4[%c0_19, %c0_20, %c0_21], %64 {strides = array<i32>} : memref<1x8x128xf32, #tpu.memory_space<vmem>>, vector<1x8x128xf32>,
    return
  }
  func.func @transform_0(%arg0: i32) -> (i32, i32) {
    %c0_i32 = arith.constant 0 : i32
    %c0_i32_0 = arith.constant 0 : i32
    return %arg0, %c0_i32 : i32, i32
  }
  func.func @transform_1(%arg0: i32) -> (i32, i32) {
    %c0_i32 = arith.constant 0 : i32
    %c0_i32_0 = arith.constant 0 : i32
    return %arg0, %c0_i32 : i32, i32
  }
  func.func @transform_2(%arg0: i32) -> (i32, i32) {
    %c0_i32 = arith.constant 0 : i32
    %c0_i32_0 = arith.constant 0 : i32
    return %arg0, %c0_i32 : i32, i32
  }
  func.func @transform_3(%arg0: i32) -> (i32, i32, i32) {
    %c0_i32 = arith.constant 0 : i32
    %c0_i32_0 = arith.constant 0 : i32
    %c0_i32_1 = arith.constant 0 : i32
    return %arg0, %c0_i32, %c0_i32_0 : i32, i32, i32
  }
}

</mosaic_0001>

<bundles_post_ra>
// kernel: tpu_custom_call.1
= control target key start
LH: loop header
LB: loop body
LE: loop exit
PB: predicated region body
PF: predicated region fallthrough
CT: control target
= control target key end

     0   :  { %8 = vsyncpa [#allocation3], 0  ;;  %s347_s0 = inlined_call_operand.hbm [shape: f32[8,32], index: 0, kind: input, shape index: {}]   ;;  %s348_s1 = inlined_call_operand.hbm [shape: f32[8,32], index: 1, kind: input, shape index: {}]   ;;  %s349_s2 = inlined_call_operand.hbm [shape: f32[8,32], index: 2, kind: input, shape index: {}]   ;;  %s350_s3 = inlined_call_operand.hbm [shape: f32[1,8,128], index: 3, kind: output, shape index: {}]  }
   0x1   :  { %9 = vsyncpa [#allocation6], 0  ;;  %s27_s14 = sshll.u32 %s348_s1, 4  ;;  %s28_s14 = int_to_ptr.hbm [resolvable:$true] %s27_s14 }
   0x2   :  { %10 = vsyncpa [#allocation4], 0  ;;  %s303_s15 = smov [#allocation5]   ;;  %s16_s19 = sshll.u32 %s347_s0, 4  ;;  %s17_s19 = int_to_ptr.hbm [resolvable:$true] %s16_s19 }
   0x3   :  { %s29_s16 = sshll.u32 %s303_s15, 4  ;;  %s304_s20 = smov [#allocation2]   ;;  %s30_s16 = int_to_ptr.vmem [resolvable:$true] %s29_s16 }
   0x4   :  { %32 = dma.hbm_to_vmem [thread:$0]  %s28_s14, 128, %s30_s16, [#allocation6]  }
   0x5   :  { %s18_s21 = sshll.u32 %s304_s20, 4  ;;  %s38_s24 = sshll.u32 %s349_s2, 4  ;;  %s19_s21 = int_to_ptr.vmem [resolvable:$true] %s18_s21  ;;  %s39_s24 = int_to_ptr.hbm [resolvable:$true] %s38_s24 }
   0x6   :  { %21 = dma.hbm_to_vmem [thread:$0]  %s17_s19, 128, %s19_s21, [#allocation3]  }
   0x7   :  { %s305_s1 = smov [#allocation7]  }
   0x8   :  { %s40_s25 = sshll.u32 %s305_s1, 4  ;;  %s41_s25 = int_to_ptr.vmem [resolvable:$true] %s40_s25 }
   0x9   :  { %43 = dma.hbm_to_vmem [thread:$0]  %s39_s24, 128, %s41_s25, [#allocation6]  }
   0xa   :  { %297 = dma.done.wait [#allocation3], 128  }
   0xb   :  { %298 = vsyncadd [#allocation3], 4294967168 }
   0xc   :  { %299 = dma.done.wait [#allocation6], 256  }
   0xd   :  { %300 = vsyncadd [#allocation6], 4294967040  ;;  %v56_v0 = vld [vmem:[#allocation7] sm:$0xff]  ;;  %vm58_vm0 = vcmask 261120   ;;  %v105_v1 = vld [vmem:[#allocation5] sm:$0xff]  ;;  %vm148_vm9 = vcmask 7168  }
   0xe   :  { %v57_v2 = vmul.f32 0.5, %v56_v0  ;;  %v106_v3 = vmul.f32 0.5, %v105_v1  ;;  %v71_v4 = vld [vmem:[#allocation2] sm:$0xff]  ;;  %s306_s0 = smov [#allocation8]   ;;  %s168_s28 = sshll.u32 %s350_s3, 4  ;;  %s169_s28 = int_to_ptr.hbm [resolvable:$true] %s168_s28 }
   0xf   :  { %v72_v7 = vmul.f32 0.5, %v71_v4  ;;  %s166_s2 = sshll.u32 %s306_s0, 4  ;;  %s167_s2 = int_to_ptr.vmem [resolvable:$true] %s166_s2 }
  0x10   :  { %v59_v5 = vsel %vm58_vm0, %v57_v2, -inf  ;;  %v107_v6 = vsel %vm58_vm0, %v106_v3, -inf }
  0x11   :  { %60 = vmax.xlane.f32.xlu0 %v59_v5  ;;  %108 = vmax.xlane.f32.xlu1 %v107_v6  ;;  %v73_v8 = vsel %vm58_vm0, %v72_v7, -inf }
  0x19   :  { %74 = vmax.xlane.f32.xlu0 %v73_v8 }
  0x84   :  { %v61_v9 = vpop.xlane.xlu0 %60  ;;  %v109_v12 = vpop.xlane.xlu1 %108 }
  0x85   :  { %v62_v10 = vsub.f32 %v57_v2, %v61_v9  ;;  %v110_v15 = vsub.f32 %v106_v3, %v109_v12 }
  0x87   :  { %v63_v11 = vmul.f32 1.442695, %v62_v10  ;;  %v111_v19 = vmul.f32 1.442695, %v110_v15 }
  0x89   :  { %185 = vpow2.f32 %v63_v11 }
  0x8c   :  { %v75_v13 = vpop.xlane.xlu0 %74 }
  0x8d   :  { %v76_v14 = vsub.f32 %v72_v7, %v75_v13 }
  0x8f   :  { %v186_v16 = vpop.eup %185  ;;  %v77_v17 = vmul.f32 1.442695, %v76_v14 }
  0x90   :  { %v65_v18 = vsel %vm58_vm0, %v186_v16, 0.0 }
  0x91   :  { %66 = vadd.xlane.f32.xlu1 %v65_v18  ;;  %187 = vpow2.f32 %v77_v17 }
  0x92   :  { %189 = vpow2.f32 %v111_v19 }
  0x97   :  { %v188_v20 = vpop.eup %187 }
  0x98   :  { %v79_v21 = vsel %vm58_vm0, %v188_v20, 0.0  ;;  %v190_v22 = vpop.eup %189 }
  0x99   :  { %80 = vadd.xlane.f32.xlu2 %v79_v21  ;;  %v113_v23 = vsel %vm58_vm0, %v190_v22, 0.0 }
  0xa1   :  { %114 = vadd.xlane.f32.xlu2 %v113_v23 }
 0x104   :  { %v67_v24 = vpop.xlane.xlu1 %66 }
 0x105   :  { %191 = vlog2.f32 %v67_v24 }
 0x10b   :  { %v192_v25 = vpop.eup %191 }
 0x10c   :  { %v69_v26 = vmul.f32 0.6931472, %v192_v25  ;;  %v81_v34 = vpop.xlane.xlu2 %80 }
 0x10d   :  { %193 = vrcp.f32 %v81_v34  ;;  %vm92_vm1 = vweird.f32 %v81_v34  ;;  %v98_v45 = vand.u32 2147483648, %v81_v34  ;;  %v96_v49 = vand.u32 2147483647, %v81_v34 }
 0x10e   :  { %v70_v27 = vsub.f32 %v62_v10, %v69_v26 }
 0x10f   :  { %v99_v51 = vor.u32 1.1754944e-38, %v98_v45  ;;  %vm97_vm8 = vcmp.eq.f32.partialorder %v96_v49, 8.507059e+37 }
 0x110   :  { %v116_v28 = vsub.f32 %v110_v15, %v70_v27  ;;  %v82_v29 = vsub.f32 %v76_v14, %v70_v27 }
 0x112   :  { %v117_v30 = vmul.f32 %v190_v22, %v116_v28  ;;  %v83_v31 = vmul.f32 %v188_v20, %v82_v29 }
 0x113   :  { %v194_v36 = vpop.eup %193 }
 0x114   :  { %v118_v32 = vsel %vm58_vm0, %v117_v30, 0.0  ;;  %v84_v33 = vsel %vm58_vm0, %v83_v31, 0.0  ;;  %v115_v35 = vpop.xlane.xlu2 %114  ;;  %v88_v38 = vmul.f32 %v194_v36, %v81_v34  ;;  %vm93_vm2 = vweird.f32 %v194_v36 }
 0x115   :  { %119 = vadd.xlane.f32.xlu1 %v118_v32  ;;  %85 = vadd.xlane.f32.xlu0 %v84_v33  ;;  %195 = vrcp.f32 %v115_v35  ;;  %vm126_vm3 = vweird.f32 %v115_v35  ;;  %v132_v44 = vand.u32 2147483648, %v115_v35  ;;  %v130_v47 = vand.u32 2147483647, %v115_v35  ;;  %vm94_vm5 = vmor %vm92_vm1, %vm93_vm2 }
 0x116   :  { %v89_v41 = vsub.f32 1.0, %v88_v38  ;;  %197 = vlog2.f32 %v81_v34 }
 0x117   :  { %199 = vlog2.f32 %v115_v35  ;;  %v133_v50 = vor.u32 1.1754944e-38, %v132_v44  ;;  %vm131_vm7 = vcmp.eq.f32.partialorder %v130_v47, 8.507059e+37 }
 0x118   :  { %v90_v43 = vmul.f32 %v194_v36, %v89_v41 }
 0x11a   :  { %v91_v48 = vadd.f32 %v194_v36, %v90_v43 }
 0x11b   :  { %v196_v37 = vpop.eup %195 }
 0x11c   :  { %v122_v39 = vmul.f32 %v196_v37, %v115_v35  ;;  %vm127_vm4 = vweird.f32 %v196_v37  ;;  %v198_v52 = vpop.eup %197  ;;  %v95_v54 = vsel %vm94_vm5, %v194_v36, %v91_v48 }
 0x11d   :  { %vm128_vm6 = vmor %vm126_vm3, %vm127_vm4  ;;  %v200_v55 = vpop.eup %199  ;;  %v100_v59 = vsel %vm97_vm8, %v99_v51, %v95_v54  ;;  %v103_v63 = vmul.f32 0.6931472, %v198_v52 }
 0x11e   :  { %v123_v40 = vsub.f32 1.0, %v122_v39  ;;  %v137_v61 = vmul.f32 0.6931472, %v200_v55 }
 0x120   :  { %v124_v42 = vmul.f32 %v196_v37, %v123_v40 }
 0x122   :  { %v125_v46 = vadd.f32 %v196_v37, %v124_v42 }
 0x124   :  { %v129_v53 = vsel %vm128_vm6, %v196_v37, %v125_v46 }
 0x125   :  { %v134_v57 = vsel %vm131_vm7, %v133_v50, %v129_v53 }
 0x188   :  { %v120_v56 = vpop.xlane.xlu1 %119  ;;  %v86_v58 = vpop.xlane.xlu0 %85 }
 0x189   :  { %v135_v60 = vmul.f32 %v134_v57, %v120_v56  ;;  %v101_v62 = vmul.f32 %v100_v59, %v86_v58 }
 0x18b   :  { %v138_v0 = vsub.f32 %v135_v60, %v137_v61  ;;  %v104_v1 = vsub.f32 %v101_v62, %v103_v63 }
 0x18d   :  { %v139_v2 = vadd.f32 %v138_v0, %v104_v1 }
 0x18f   :  { %v140_v3 = vmul.f32 0.5, %v139_v2 }
 0x191   :  { %v149_v4 = vsel %vm148_vm9, %v140_v3, 0.0 }
 0x192   :  { %150 = vadd.xlane.f32.xlu2 %v149_v4 }
 0x205   :  { %v151_v5 = vpop.xlane.xlu2 %150 }
 0x206   :  { %v152_v6 = vrot.slane %v151_v5, 4 }
 0x208   :  { %v153_v7 = vadd.f32 %v152_v6, %v151_v5 }
 0x20a   :  { %v154_v8 = vrot.slane %v153_v7, 2 }
 0x20c   :  { %v155_v9 = vadd.f32 %v154_v8, %v153_v7 }
 0x20e   :  { %v156_v10 = vrot.slane %v155_v9, 1 }
 0x210   :  { %v157_v11 = vadd.f32 %v156_v10, %v155_v9 }
 0x212   :  { %179 = vpush %v157_v11 }
 0x243   :  { %s180_s29 = spop %179 }
 0x244   :  { %v159_v12 = vstv %s180_s29 }
 0x245   :  { %160 = vst [vmem:[#allocation8] sm:$0xff] %v159_v12 }
 0x246   :  { %171 = dma.vmem_to_hbm [thread:$0]  %s167_s2, 128, %s169_s28, [#allocation4]  }
 0x247   :  { %301 = dma.done.wait [#allocation4], 128  }
 0x248   :  { %302 = vsyncadd [#allocation4], 4294967168 }
 0x249   :  { %176 = vsyncpa [#allocation3], 1 }
 0x24a   :  { %177 = vsyncpa [#allocation6], 1 }
 0x24b   :  { %178 = vsyncpa [#allocation4], 1 }

</bundles_post_ra>
